<compile_context>
chip_gen: v5e
topology: v5e:2x2
jax: 0.10.0
libtpu: 0.0.40
codegen_flags: <defaults>
</compile_context>

<pallas_src>
import jax
import jax.numpy as jnp
import numpy as np
from jax.experimental import pallas as pl
from jax.experimental.pallas import tpu as pltpu


def _round_up(x, m):
    return ((x + m - 1) // m) * m


# ----------------------------------------------------------------------------
# Kernel
# ----------------------------------------------------------------------------
def _disc_pop_kernel(x_ref, w_ref, b_ref, c_ref, d_ref, out_ref):
    """out = tanh(x @ W + b) @ C + d   for one batch tile.

    x_ref  : (TB, E)  activations (compute_dtype), pipelined batch tile
    w_ref  : (E, H)   first linear weight (compute_dtype), VMEM-resident
    b_ref  : (1, H)   first linear bias   (f32),           VMEM-resident
    c_ref  : (H, P)   classifier weight   (compute_dtype), VMEM-resident
    d_ref  : (1, P)   classifier bias     (f32),           VMEM-resident
    out_ref: (TB, P)  f32 logits (P == real n_pop, masked vst)
    """
    # first linear: MXU matmul with f32 accumulation, broadcast bias add (VALU),
    # tanh on the EUP in f32
    h = jnp.tanh(
        jnp.dot(x_ref[...], w_ref[...], preferred_element_type=jnp.float32)
        + b_ref[...])

    # classifier: second MXU matmul (f32 acc) + broadcast bias add
    out = jnp.dot(h.astype(c_ref.dtype), c_ref[...],
                  preferred_element_type=jnp.float32)
    out_ref[...] = out + d_ref[...]


# ----------------------------------------------------------------------------
# Parameter construction (deterministic, mimics nn.Linear uniform init)
# ----------------------------------------------------------------------------
def init_discriminator_pop_params(key, embedding_size, n_pop):
    E, H, P = embedding_size, embedding_size, n_pop

    def linear(k, fan_in, fan_out):
        kw, kb = jax.random.split(k)
        bound = 1.0 / np.sqrt(fan_in)
        # stored transposed: (in, out), so forward is x @ W + b
        w = jax.random.uniform(kw, (fan_in, fan_out), jnp.float32, -bound, bound)
        b = jax.random.uniform(kb, (fan_out,), jnp.float32, -bound, bound)
        return w, b

    k1, k2 = jax.random.split(key)
    w, b = linear(k1, E, H)   # linear
    c, d = linear(k2, H, P)   # classifer
    return dict(w=w, b=b, c=c, d=d)


# ----------------------------------------------------------------------------
# Batch-tile selection
# ----------------------------------------------------------------------------
def _choose_tb(batch, tb_max):
    """Largest sublane-aligned batch tile <= tb_max; keep >=2 grid steps when
    the batch allows so both v7x TensorCores are used (harmless on v5e/v6e)."""
    tb_max = max(8, (tb_max // 8) * 8)
    b8 = _round_up(max(batch, 1), 8)
    if b8 <= tb_max:
        if b8 > 8:
            return _round_up((b8 + 1) // 2, 8)   # split whole batch in two tiles
        return b8
    return tb_max


# ----------------------------------------------------------------------------
# Wrapper
# ----------------------------------------------------------------------------
def discriminator_pop_forward(params, item_emb, *,
                              compute_dtype=jnp.bfloat16, tb_max=4096):
    """Pallas implementation of Discriminator_pop.forward(item_emb).

    compute_dtype applies to the activation tile and the two weight matrices
    (MXU operands); accumulation, biases, tanh and the output stay in f32.
    Pass item_emb already in bf16 to avoid the wrapper-side cast entirely.
    """
    E, H = params["w"].shape
    P = params["c"].shape[1]
    B = item_emb.shape[0]

    TB = _choose_tb(B, tb_max)
    B_pad = _round_up(B, TB)

    x = item_emb.astype(compute_dtype)
    if B_pad != B:
        # row-pad only (no column augmentation / repacking of the activations)
        x = jnp.pad(x, ((0, B_pad - B), (0, 0)))

    w = params["w"].astype(compute_dtype)                      # (E, H)
    c = params["c"].astype(compute_dtype)                      # (H, P)
    b = params["b"].astype(jnp.float32).reshape(1, H)          # f32 bias
    d = params["d"].astype(jnp.float32).reshape(1, P)          # f32 bias

    grid = (B_pad // TB,)
    out = pl.pallas_call(
        _disc_pop_kernel,
        out_shape=jax.ShapeDtypeStruct((B_pad, P), jnp.float32),
        grid_spec=pltpu.PrefetchScalarGridSpec(
            num_scalar_prefetch=0,
            grid=grid,
            in_specs=[
                pl.BlockSpec((TB, E), lambda i: (i, 0)),   # pipelined batch tiles
                pl.BlockSpec((E, H), lambda i: (0, 0)),    # resident weight
                pl.BlockSpec((1, H), lambda i: (0, 0)),    # resident bias
                pl.BlockSpec((H, P), lambda i: (0, 0)),    # resident weight
                pl.BlockSpec((1, P), lambda i: (0, 0)),    # resident bias
            ],
            out_specs=pl.BlockSpec((TB, P), lambda i: (i, 0)),
        ),
        compiler_params=pltpu.CompilerParams(
            dimension_semantics=("parallel",)),
    )(x, w, b, c, d)

    if B_pad != B:
        out = out[:B]      # padded rows carry tanh(b) @ C + d; never consumed
    return out


# Pure-JAX reference for verification.
def discriminator_pop_forward_ref(params, item_emb):
    h = jnp.tanh(item_emb @ params["w"] + params["b"])
    return h @ params["c"] + params["d"]


# TODO(synk): calculate_loss / nn.CrossEntropyLoss is a training-time loss, not
# part of the forward pass; not implemented as a Pallas kernel.


# ----------------------------------------------------------------------------
# Main
# ----------------------------------------------------------------------------
if __name__ == "__main__":
    EMB = 32            # embedding_size (= hidden_size)
    N_POP = 16          # n_pop (p_class)

    key = jax.random.PRNGKey(0)
    kp, k1, k2 = jax.random.split(key, 3)
    params = init_discriminator_pop_params(kp, EMB, N_POP)

    # --- tiny batch, f32 operands (single grid step, exact check) ------------
    B = 8
    item_emb = jax.random.normal(k1, (B, EMB), jnp.float32)
    out = jax.block_until_ready(
        discriminator_pop_forward(params, item_emb, compute_dtype=jnp.float32))
    ref = discriminator_pop_forward_ref(params, item_emb)
    assert out.shape == (B, N_POP)
    np.testing.assert_allclose(np.asarray(out), np.asarray(ref),
                               rtol=1e-5, atol=1e-5)

    # --- tiny batch, default bf16 MXU operands -------------------------------
    out_bf = jax.block_until_ready(discriminator_pop_forward(params, item_emb))
    np.testing.assert_allclose(np.asarray(out_bf), np.asarray(ref),
                               rtol=5e-2, atol=5e-2)

    # --- larger (ragged) batch: multi-step batch grid, f32 -------------------
    B2 = 200
    item_emb2 = jax.random.normal(k2, (B2, EMB), jnp.float32)
    out2 = jax.block_until_ready(
        discriminator_pop_forward(params, item_emb2,
                                  compute_dtype=jnp.float32, tb_max=64))
    ref2 = discriminator_pop_forward_ref(params, item_emb2)
    assert out2.shape == (B2, N_POP)
    np.testing.assert_allclose(np.asarray(out2), np.asarray(ref2),
                               rtol=1e-5, atol=1e-5)

    # --- larger batch, default tb_max (2 parallel tiles for v7x), bf16 -------
    out3 = jax.block_until_ready(discriminator_pop_forward(params, item_emb2))
    np.testing.assert_allclose(np.asarray(out3), np.asarray(ref2),
                               rtol=5e-2, atol=5e-2)

    print("KERNEL_OK")
</pallas_src>

<mosaic_0001>
module attributes {stable_mosaic.version = 11 : i64} {
  func.func @_disc_pop_kernel(%arg0: i32, %arg1: memref<8x32xf32, #tpu.memory_space<vmem>>, %arg2: memref<32x32xf32, #tpu.memory_space<vmem>>, %arg3: memref<1x32xf32, #tpu.memory_space<vmem>>, %arg4: memref<32x16xf32, #tpu.memory_space<vmem>>, %arg5: memref<1x16xf32, #tpu.memory_space<vmem>>, %arg6: memref<8x16xf32, #tpu.memory_space<vmem>>) attributes {dimension_semantics = [#tpu.dimension_semantics<parallel>], iteration_bounds = array<i64: 1>, scalar_prefetch = 0 : i64, scratch_operands = 0 : i64, tpu.core_type = #tpu.core_type<tc>, window_params = [{transform_indices = @transform_0, window_bounds = array<i64: 8, 32>}, {pipeline_mode = #tpu.pipeline_mode<synchronous>, transform_indices = @transform_1, window_bounds = array<i64: 32, 32>}, {pipeline_mode = #tpu.pipeline_mode<synchronous>, transform_indices = @transform_2, window_bounds = array<i64: 1, 32>}, {pipeline_mode = #tpu.pipeline_mode<synchronous>, transform_indices = @transform_3, window_bounds = array<i64: 32, 16>}, {pipeline_mode = #tpu.pipeline_mode<synchronous>, transform_indices = @transform_4, window_bounds = array<i64: 1, 16>}, {transform_indices = @transform_5, window_bounds = array<i64: 8, 16>}]} {
    %c0 = arith.constant 0 : index
    %c0_0 = arith.constant 0 : index
    %0 = vector.load %arg1[%c0, %c0_0] : memref<8x32xf32, #tpu.memory_space<vmem>>, vector<8x32xf32>
    %c0_1 = arith.constant 0 : index
    %c0_2 = arith.constant 0 : index
    %1 = vector.load %arg2[%c0_1, %c0_2] : memref<32x32xf32, #tpu.memory_space<vmem>>, vector<32x32xf32>
    %cst = arith.constant dense<0.000000e+00> : vector<8x32xf32>
    %2 = tpu.matmul %0, %1, %cst {dimension_numbers = #tpu.dot_dimension_numbers<[1], [0], [0], [1], [0, 0, 1, 1], [], []>} : vector<8x32xf32>, vector<32x32xf32>, vector<8x32xf32> -> vector<8x32xf32>
    %c0_3 = arith.constant 0 : index
    %c0_4 = arith.constant 0 : index
    %3 = vector.load %arg3[%c0_3, %c0_4] : memref<1x32xf32, #tpu.memory_space<vmem>>, vector<1x32xf32>
    %4 = vector.broadcast %3 : vector<1x32xf32> to vector<8x32xf32>
    %5 = arith.addf %2, %4 : vector<8x32xf32>
    %6 = math.tanh %5 : vector<8x32xf32>
    %c0_5 = arith.constant 0 : index
    %c0_6 = arith.constant 0 : index
    %7 = vector.load %arg4[%c0_5, %c0_6] : memref<32x16xf32, #tpu.memory_space<vmem>>, vector<32x16xf32>
    %cst_7 = arith.constant dense<0.000000e+00> : vector<8x16xf32>
    %8 = tpu.matmul %6, %7, %cst_7 {dimension_numbers = #tpu.dot_dimension_numbers<[1], [0], [0], [1], [0, 0, 1, 1], [], []>} : vector<8x32xf32>, vector<32x16xf32>, vector<8x16xf32> -> vector<8x16xf32>
    %c0_8 = arith.constant 0 : index
    %c0_9 = arith.constant 0 : index
    %9 = vector.load %arg5[%c0_8, %c0_9] : memref<1x16xf32, #tpu.memory_space<vmem>>, vector<1x16xf32>
    %10 = vector.broadcast %9 : vector<1x16xf32> to vector<8x16xf32>
    %11 = arith.addf %8, %10 : vector<8x16xf32>
    %c0_10 = arith.constant 0 : index
    %c0_11 = arith.constant 0 : index
    %12 = vector.load %arg6[%c0_10, %c0_11] : memref<8x16xf32, #tpu.memory_space<vmem>>, vector<8x16xf32>
    tpu.vector_store %arg6[%c0_10, %c0_11], %11 {strides = array<i32>} : memref<8x16xf32, #tpu.memory_space<vmem>>, vector<8x16xf32>,
    return
  }
  func.func @transform_0(%arg0: i32) -> (i32, i32) {
    %c0_i32 = arith.constant 0 : i32
    %c0_i32_0 = arith.constant 0 : i32
    return %arg0, %c0_i32 : i32, i32
  }
  func.func @transform_1(%arg0: i32) -> (i32, i32) {
    %c0_i32 = arith.constant 0 : i32
    %c0_i32_0 = arith.constant 0 : i32
    %c0_i32_1 = arith.constant 0 : i32
    return %c0_i32, %c0_i32_0 : i32, i32
  }
  func.func @transform_2(%arg0: i32) -> (i32, i32) {
    %c0_i32 = arith.constant 0 : i32
    %c0_i32_0 = arith.constant 0 : i32
    %c0_i32_1 = arith.constant 0 : i32
    return %c0_i32, %c0_i32_0 : i32, i32
  }
  func.func @transform_3(%arg0: i32) -> (i32, i32) {
    %c0_i32 = arith.constant 0 : i32
    %c0_i32_0 = arith.constant 0 : i32
    %c0_i32_1 = arith.constant 0 : i32
    return %c0_i32, %c0_i32_0 : i32, i32
  }
  func.func @transform_4(%arg0: i32) -> (i32, i32) {
    %c0_i32 = arith.constant 0 : i32
    %c0_i32_0 = arith.constant 0 : i32
    %c0_i32_1 = arith.constant 0 : i32
    return %c0_i32, %c0_i32_0 : i32, i32
  }
  func.func @transform_5(%arg0: i32) -> (i32, i32) {
    %c0_i32 = arith.constant 0 : i32
    %c0_i32_0 = arith.constant 0 : i32
    return %arg0, %c0_i32 : i32, i32
  }
}

</mosaic_0001>

<bundles_post_ra>
// kernel: tpu_custom_call.1
= control target key start
LH: loop header
LB: loop body
LE: loop exit
PB: predicated region body
PF: predicated region fallthrough
CT: control target
= control target key end

     0   :  { %s206_s0 = inlined_call_operand.vmem [shape: f32[8,32], index: 0, kind: input, shape index: {}]   ;;  %s207_s1 = inlined_call_operand.vmem [shape: f32[32,32], index: 1, kind: input, shape index: {}]   ;;  %s208_s2 = inlined_call_operand.vmem [shape: f32[1,32], index: 2, kind: input, shape index: {}]   ;;  %s209_s3 = inlined_call_operand.vmem [shape: f32[32,16], index: 3, kind: input, shape index: {}]   ;;  %s210_s4 = inlined_call_operand.vmem [shape: f32[1,16], index: 4, kind: input, shape index: {}]   ;;  %s211_s5 = inlined_call_operand.hbm [shape: f32[8,16], index: 5, kind: output, shape index: {}]  }
   0x1   :  { %v25_v0 = vld [vmem:[%s207_s1 + $0x18] sm:$0xff]  ;;  %v24_v1 = vld [vmem:[%s207_s1 + $0x10] sm:$0xff]  ;;  %v23_v2 = vld [vmem:[%s207_s1 + $0x8] sm:$0xff] }
   0x2   :  { %46 = vmatpush.msra.mxu0 %v25_v0 }
   0x3   :  { %10 = vsyncpa [#allocation3], 0  ;;  %v22_v3 = vld [vmem:[%s207_s1] sm:$0xff]  ;;  %vm30_vm0 = vcmask 261120   ;;  %v58_v5 = vld [vmem:[%s209_s3 + $0x18] sm:$0xff]  ;;  %s137_s13 = smov [#allocation2]  }
   0x4   :  { %47 = vmatpush.msra.mxu0 %v24_v1  ;;  %v21_v4 = vld [vmem:[%s206_s0] sm:$0xff]  ;;  %78 = vmatpush.msra.mxu1 %v58_v5  ;;  %v57_v6 = vld [vmem:[%s209_s3 + $0x10] sm:$0xff]  ;;  %v56_v7 = vld [vmem:[%s209_s3 + $0x8] sm:$0xff]  ;;  %s93_s14 = sshll.u32 %s137_s13, 4  ;;  %s95_s16 = sshll.u32 %s211_s5, 4  ;;  %vm86_vm1 = vcmask 130048   ;;  %s94_s14 = int_to_ptr.vmem [resolvable:$true] %s93_s14  ;;  %s96_s16 = int_to_ptr.hbm [resolvable:$true] %s95_s16 }
   0x5   :  { %v55_v8 = vld [vmem:[%s209_s3] sm:$0xff] }
   0x6   :  { %48 = vmatpush.msra.mxu0 %v23_v2  ;;  %79 = vmatpush.msra.mxu1 %v57_v6  ;;  %v107_v9 = vld [vmem:[%s208_s2] ss:$0 sm:$0xff] }
   0x7   :  { %v108_v13 = vld [vmem:[%s210_s4] ss:$0 sm:$0xff] }
   0x8   :  { %49 = vmatpush.msra.mxu0 %v22_v3  ;;  %80 = vmatpush.msra.mxu1 %v56_v7 }
   0x9   :  { %104 = vmatmul.msk.f32.vlgmr.msra.gmra.mxu0 %vm30_vm0, %v21_v4 }
   0xa   :  { %81 = vmatpush.msra.mxu1 %v55_v8 }
  0x86   :  { %v51_v10 = vpop.f32.mrf.mxu0 }
  0x87   :  { %v52_v11 = vadd.f32 %v107_v9, %v51_v10 }
  0x89   :  { %109 = vtanh.f32 %v52_v11 }
  0x8f   :  { %v110_v12 = vpop.eup %109 }
  0x90   :  { %105 = vmatmul.msk.f32.vlgmr.msra.gmra.mxu1 %vm30_vm0, %v110_v12 }
 0x10d   :  { %v83_v14 = vpop.f32.mrf.mxu1 }
 0x10e   :  { %v84_v15 = vadd.f32 %v108_v13, %v83_v14 }
 0x110   :  { %87 = vst.msk [vmem:[#allocation2] sm:$0xff] %vm86_vm1, %v84_v15 }
 0x111   :  { %98 = dma.vmem_to_hbm [thread:$0]  %s94_s14, 128, %s96_s16, [#allocation3]  }
 0x112   :  { %135 = dma.done.wait [#allocation3], 128  }
 0x113   :  { %136 = vsyncadd [#allocation3], 4294967168 }
 0x114   :  { %103 = vsyncpa [#allocation3], 1 }

</bundles_post_ra>
